<compile_context>
chip_gen: v7x
topology: tpu7x:2x2x1
jax: 0.10.0
libtpu: 0.0.40
codegen_flags: <defaults>
</compile_context>

<pallas_src>
import functools
import math

import jax
import jax.numpy as jnp
import numpy as np
from jax import lax
from jax.experimental import pallas as pl
from jax.experimental.pallas import tpu as pltpu

# Safe on v5e/v6e (128 MiB physical VMEM) and v7x (64 MiB physical per TensorCore).
_VMEM_LIMIT = 40 * 1024 * 1024


def _round_up(x: int, m: int) -> int:
    return ((x + m - 1) // m) * m


def _pick_tile(dim: int, pref: int, gran: int) -> int:
    """Largest multiple of `gran`, <= pref, dividing round_up(dim, gran).

    Guarantees wrapper-side padding of at most gran-1 elements along that dim
    (zero for production-aligned shapes)."""
    dim_r = _round_up(dim, gran)
    best = gran
    t = gran
    limit = min(pref, dim_r)
    while t <= limit:
        if dim_r % t == 0:
            best = t
        t += gran
    return best


# ----------------------------------------------------------------------------
# Tiled matmul + bias kernel: out[M, N] = x[M, K] @ w_t[K, N] + b[1, N]
# ----------------------------------------------------------------------------
def _matmul_bias_kernel(x_ref, w_ref, b_ref, o_ref, acc_ref):
    k = pl.program_id(2)

    @pl.when(k == 0)
    def _():
        acc_ref[...] = jnp.zeros_like(acc_ref)

    acc_ref[...] += jnp.dot(x_ref[...], w_ref[...],
                            preferred_element_type=jnp.float32)

    @pl.when(k == pl.num_programs(2) - 1)
    def _():
        o_ref[...] = (acc_ref[...] + b_ref[...]).astype(o_ref.dtype)


def _matmul_bias(x, w_t, b, *, tm=512, tn=512, tk=512, out_dtype=None):
    """x: (M, K) @ w_t: (K, N) + b: (N,) -> (M, N), tiled over (M, N, K)."""
    M, K = x.shape
    Kw, N = w_t.shape
    assert K == Kw, (K, Kw)
    out_dtype = out_dtype or x.dtype

    sub = 16 if x.dtype == jnp.bfloat16 else 8
    tm_ = _pick_tile(M, tm, sub)
    tn_ = _pick_tile(N, tn, 128)
    tk_ = _pick_tile(K, tk, 128)

    Mp, Np, Kp = _round_up(M, sub), _round_up(N, 128), _round_up(K, 128)

    xp = x if (Mp == M and Kp == K) else jnp.pad(x, ((0, Mp - M), (0, Kp - K)))
    wp = w_t if (Kp == K and Np == N) else jnp.pad(w_t, ((0, Kp - K), (0, Np - N)))
    bp = b.reshape(1, N).astype(jnp.float32)
    if Np != N:
        bp = jnp.pad(bp, ((0, 0), (0, Np - N)))

    grid = (Mp // tm_, Np // tn_, Kp // tk_)

    out = pl.pallas_call(
        _matmul_bias_kernel,
        out_shape=jax.ShapeDtypeStruct((Mp, Np), out_dtype),
        grid=grid,
        in_specs=[
            pl.BlockSpec((tm_, tk_), lambda i, j, k: (i, k)),
            pl.BlockSpec((tk_, tn_), lambda i, j, k: (k, j)),
            # Index depends only on j -> Pallas dedups this DMA across the k axis.
            pl.BlockSpec((1, tn_), lambda i, j, k: (0, j)),
        ],
        out_specs=pl.BlockSpec((tm_, tn_), lambda i, j, k: (i, j)),
        scratch_shapes=[pltpu.VMEM((tm_, tn_), jnp.float32)],
        compiler_params=pltpu.CompilerParams(
            dimension_semantics=("parallel", "parallel", "arbitrary"),
            vmem_limit_bytes=_VMEM_LIMIT,
        ),
    )(xp, wp, bp)

    if Mp != M or Np != N:
        out = out[:M, :N]
    return out


# ----------------------------------------------------------------------------
# Flash-style attention on token-major slabs (no HBM transposes), GQA folded
# into the kernel: all query heads of all kv heads processed per grid step.
# ----------------------------------------------------------------------------
def _flash_kernel(q_ref, k_ref, v_ref, o_ref, m_sc, l_sc, acc_sc, *,
                  scale, nheads, kvheads, dk, dv, kv_len, tkv, mask_kv):
    ki = pl.program_id(2)
    expansion = nheads // kvheads

    @pl.when(ki == 0)
    def _():
        m_sc[...] = jnp.full_like(m_sc, -jnp.inf)
        l_sc[...] = jnp.zeros_like(l_sc)
        acc_sc[...] = jnp.zeros_like(acc_sc)

    if mask_kv:
        # Only built when the sequence is actually padded; by construction the
        # padding is < tkv so the last KV tile always keeps >= 1 valid column
        # (no fully -inf softmax rows).
        kv_idx = ki * tkv + lax.broadcasted_iota(jnp.int32, (1, tkv), 1)
        tail = jnp.where(kv_idx < kv_len, 0.0, -jnp.inf).astype(jnp.float32)

    for g in range(kvheads):
        k_g = k_ref[:, g * dk:(g + 1) * dk]          # (tkv, dk)
        v_g = v_ref[:, g * dv:(g + 1) * dv]          # (tkv, dv)
        for e in range(expansion):
            h = g * expansion + e
            # Scale the small Q tile (tq x dk) instead of the (tq x tkv) scores.
            q_h = q_ref[:, h * dk:(h + 1) * dk] * scale
            s = lax.dot_general(q_h, k_g, (((1,), (1,)), ((), ())),
                                preferred_element_type=jnp.float32)  # (tq, tkv)
            if mask_kv:
                s = s + tail

            m_prev = m_sc[h]                          # (tq, 1)
            m_new = jnp.maximum(m_prev, jnp.max(s, axis=-1, keepdims=True))
            alpha = jnp.exp(m_prev - m_new)
            p = jnp.exp(s - m_new)
            l_sc[h] = alpha * l_sc[h] + jnp.sum(p, axis=-1, keepdims=True)
            acc_sc[h] = alpha * acc_sc[h] + jnp.dot(
                p.astype(v_g.dtype), v_g, preferred_element_type=jnp.float32)
            m_sc[h] = m_new

    @pl.when(ki == pl.num_programs(2) - 1)
    def _():
        outs = []
        for h in range(nheads):
            inv = pl.reciprocal(l_sc[h], approx=True)      # EUP slot, nearly free
            outs.append((acc_sc[h] * inv).astype(o_ref.dtype))
        # One lane-dense store of the whole (tq, nheads*dv) output tile.
        o_ref[...] = jnp.concatenate(outs, axis=-1)


def _flash_attention(q_slab, k_slab, v_slab, *, nheads, kvheads, dk, dv,
                     kv_len, ts):
    """q_slab: (B, Sp, nheads*dk); k_slab: (B, Sp, kvheads*dk);
    v_slab: (B, Sp, kvheads*dv) -> (B, Sp, nheads*dv). All token-major."""
    B, Sp, _ = q_slab.shape
    assert Sp % ts == 0
    scale = 1.0 / math.sqrt(dk)

    kernel = functools.partial(
        _flash_kernel, scale=scale, nheads=nheads, kvheads=kvheads,
        dk=dk, dv=dv, kv_len=kv_len, tkv=ts, mask_kv=(Sp != kv_len))

    grid = (B, Sp // ts, Sp // ts)

    return pl.pallas_call(
        kernel,
        out_shape=jax.ShapeDtypeStruct((B, Sp, nheads * dv), q_slab.dtype),
        grid=grid,
        in_specs=[
            # Leading batch dim squeezed out of the kernel refs (2-D tiles).
            pl.BlockSpec((None, ts, nheads * dk), lambda b, qi, ki: (b, qi, 0)),
            pl.BlockSpec((None, ts, kvheads * dk), lambda b, qi, ki: (b, ki, 0)),
            pl.BlockSpec((None, ts, kvheads * dv), lambda b, qi, ki: (b, ki, 0)),
        ],
        out_specs=pl.BlockSpec((None, ts, nheads * dv),
                               lambda b, qi, ki: (b, qi, 0)),
        scratch_shapes=[
            pltpu.VMEM((nheads, ts, 1), jnp.float32),     # running max
            pltpu.VMEM((nheads, ts, 1), jnp.float32),     # running denom
            pltpu.VMEM((nheads, ts, dv), jnp.float32),    # running numerator
        ],
        compiler_params=pltpu.CompilerParams(
            dimension_semantics=("parallel", "parallel", "arbitrary"),
            vmem_limit_bytes=_VMEM_LIMIT,
        ),
    )(q_slab, k_slab, v_slab)


# ----------------------------------------------------------------------------
# Full MHA forward (fused QKV -> attention -> dense)
# ----------------------------------------------------------------------------
@functools.partial(jax.jit, static_argnames=("nheads", "kvheads", "emb_kq", "emb_v"))
def _mha_forward(x, w_qkv_t, b_qkv, w_dense_t, b_dense,
                 *, nheads, kvheads, emb_kq, emb_v):
    B, S, E = x.shape
    dq = nheads * emb_kq
    dk = kvheads * emb_kq
    dv = kvheads * emb_v

    # Common q/kv tile; pad the sequence once up front (at most 7 rows) and
    # carry the padded length through the whole forward, slicing only at the end.
    ts = _pick_tile(S, 256, 8)
    Sp = _round_up(S, ts)
    if Sp != S:
        x = jnp.pad(x, ((0, 0), (0, Sp - S), (0, 0)))

    # 1) fused QKV projection: one wide lane-dense slab, column-split (no transposes)
    qkv = _matmul_bias(x.reshape(B * Sp, E), w_qkv_t, b_qkv)       # (B*Sp, dq+dk+dv)
    qkv = qkv.reshape(B, Sp, dq + dk + dv)
    q_slab = qkv[..., :dq]                                         # (B, Sp, H*Dk)
    k_slab = qkv[..., dq:dq + dk]                                  # (B, Sp, KVH*Dk)
    v_slab = qkv[..., dq + dk:]                                    # (B, Sp, KVH*Dv)

    # 2) flash attention directly on token-major slabs (GQA inside the kernel)
    attn = _flash_attention(q_slab, k_slab, v_slab,
                            nheads=nheads, kvheads=kvheads,
                            dk=emb_kq, dv=emb_v, kv_len=S, ts=ts)  # (B, Sp, H*Dv)

    # 3) output projection on the already lane-dense slab
    out = _matmul_bias(attn.reshape(B * Sp, nheads * emb_v), w_dense_t, b_dense)
    out = out.reshape(B, Sp, E)
    if Sp != S:
        out = out[:, :S, :]
    return out, k_slab, v_slab


class TPMultiHeadAttentionPallas:
    """TPMultiHeadAttention forward (fused QKV, world_size == 1) on Pallas TPU kernels."""

    def __init__(self, emb_dim, emb_kq, emb_v, nheads, kvheads,
                 p_dropout=None, use_bias=False, key=None, dtype=jnp.float32):
        assert nheads % kvheads == 0
        self.emb_dim = emb_dim
        self.emb_kq_per_head = emb_kq
        self.emb_v_per_head = emb_v
        self.nheads = nheads
        self.kvheads = kvheads
        self.p_dropout = p_dropout if p_dropout is not None else 0.0
        self.use_bias = use_bias

        splits = [nheads * emb_kq, kvheads * emb_kq, kvheads * emb_v]
        d_qkv = sum(splits)

        kw, kb, kd, kdb = jax.random.split(key, 4)
        std = 0.02  # trunc_normal_(std=0.02)-style init
        # nn.Linear layout: weight (out_features, in_features)
        self.w_qkv = (jax.random.normal(kw, (d_qkv, emb_dim)) * std).astype(dtype)
        self.w_dense = (jax.random.normal(kd, (emb_dim, nheads * emb_v)) * std).astype(dtype)
        if use_bias:
            self.b_qkv = (jax.random.normal(kb, (d_qkv,)) * std).astype(dtype)
            self.b_dense = (jax.random.normal(kdb, (emb_dim,)) * std).astype(dtype)
        else:
            # Kernel always adds a bias row; zeros preserve no-bias semantics.
            self.b_qkv = jnp.zeros((d_qkv,), dtype)
            self.b_dense = jnp.zeros((emb_dim,), dtype)

        # Pre-transposed weights, hoisted out of the forward path.
        self.w_qkv_t = jnp.asarray(self.w_qkv.T)      # (E, dq+dk+dv)
        self.w_dense_t = jnp.asarray(self.w_dense.T)  # (H*emb_v, E)

    def __call__(self, q, k=None, v=None, mask=None, position_ids=None,
                 attn_algorithm=None, past_key_value_state=None, use_cache=False,
                 is_self=True, is_causal_mask=False):
        # Fused-QKV / TP semantics: k and v must be None or identical to q.
        if not ((k is None and v is None) or (k is q and v is q)):
            raise ValueError("q, k, and v must be the same or k and v must be None")
        if mask is not None or is_causal_mask or past_key_value_state is not None \
                or position_ids is not None:
            # TODO(synk): attention mask / causal mask / kv-cache concat / RoPE
            # position encoder are not implemented in the Pallas path.
            raise NotImplementedError("mask / cache / position_ids not supported")
        # attn_algorithm only toggles CUDA SDP backends in the reference; ignored.
        # Inference (eval) path: dropout_p == 0 exactly like F.sdpa with training=False.
        # TODO(synk): attention dropout for training; TP copy/all-reduce (world_size==1).

        out, k_slab, v_slab = _mha_forward(
            q, self.w_qkv_t, self.b_qkv, self.w_dense_t, self.b_dense,
            nheads=self.nheads, kvheads=self.kvheads,
            emb_kq=self.emb_kq_per_head, emb_v=self.emb_v_per_head)

        if use_cache:
            # Cache layout (B, kvheads, S, head_dim) is only materialized on demand.
            B, S, _ = q.shape
            keys = k_slab[:, :S, :].reshape(
                B, S, self.kvheads, self.emb_kq_per_head).transpose(0, 2, 1, 3)
            values = v_slab[:, :S, :].reshape(
                B, S, self.kvheads, self.emb_v_per_head).transpose(0, 2, 1, 3)
            return out, (keys, values)
        return out


# ----------------------------------------------------------------------------
# Pure-JAX reference (high precision) for correctness checking
# ----------------------------------------------------------------------------
def _reference_mha(q, w_qkv, b_qkv, w_dense, b_dense, nheads, kvheads, emb_kq, emb_v):
    hi = jax.lax.Precision.HIGHEST
    B, S, E = q.shape
    dq = nheads * emb_kq
    dk = kvheads * emb_kq

    qkv = jnp.einsum("bse,de->bsd", q, w_qkv, precision=hi) + b_qkv
    q_out, k_out, v_out = jnp.split(qkv, [dq, dq + dk], axis=-1)
    queries = q_out.reshape(B, S, nheads, emb_kq).transpose(0, 2, 1, 3)
    keys = k_out.reshape(B, S, kvheads, emb_kq).transpose(0, 2, 1, 3)
    values = v_out.reshape(B, S, kvheads, emb_v).transpose(0, 2, 1, 3)

    expansion = nheads // kvheads
    keys_e = jnp.repeat(keys, expansion, axis=1)
    values_e = jnp.repeat(values, expansion, axis=1)

    scale = 1.0 / math.sqrt(emb_kq)
    scores = jnp.einsum("bhqd,bhkd->bhqk", queries, keys_e, precision=hi) * scale
    probs = jax.nn.softmax(scores, axis=-1)
    attn = jnp.einsum("bhqk,bhkd->bhqd", probs, values_e, precision=hi)
    attn = attn.transpose(0, 2, 1, 3).reshape(B, S, nheads * emb_v)
    out = jnp.einsum("bsf,ef->bse", attn, w_dense, precision=hi) + b_dense
    return out, keys, values


if __name__ == "__main__":
    key = jax.random.PRNGKey(0)
    k_param, k_q, k_q2 = jax.random.split(key, 3)

    batch, seq, emb_dim = 2, 8, 32
    nheads, kvheads = 4, 2
    emb_kq, emb_v = 8, 8

    mha = TPMultiHeadAttentionPallas(emb_dim, emb_kq, emb_v, nheads, kvheads,
                                     use_bias=True, key=k_param)

    q_in = jax.random.normal(k_q, (batch, seq, emb_dim), jnp.float32)

    # Self-attention (k=v=None) and explicit q,q,q call with cache.
    out = mha(q_in)
    out_c, (keys, values) = mha(q_in, q_in, q_in, use_cache=True)
    jax.block_until_ready((out, out_c, keys, values))

    ref_out, ref_keys, ref_values = _reference_mha(
        q_in, mha.w_qkv, mha.b_qkv, mha.w_dense, mha.b_dense,
        nheads, kvheads, emb_kq, emb_v)

    np.testing.assert_allclose(np.asarray(out), np.asarray(ref_out),
                               rtol=2e-3, atol=1e-3)
    np.testing.assert_allclose(np.asarray(out_c), np.asarray(ref_out),
                               rtol=2e-3, atol=1e-3)
    np.testing.assert_allclose(np.asarray(keys), np.asarray(ref_keys),
                               rtol=2e-3, atol=2e-4)
    np.testing.assert_allclose(np.asarray(values), np.asarray(ref_values),
                               rtol=2e-3, atol=2e-4)

    # Ragged sequence length: exercises sequence padding + KV-tail masking.
    seq2 = 20
    q_in2 = jax.random.normal(k_q2, (1, seq2, emb_dim), jnp.float32)
    out2 = mha(q_in2)
    jax.block_until_ready(out2)
    ref_out2, _, _ = _reference_mha(
        q_in2, mha.w_qkv, mha.b_qkv, mha.w_dense, mha.b_dense,
        nheads, kvheads, emb_kq, emb_v)
    np.testing.assert_allclose(np.asarray(out2), np.asarray(ref_out2),
                               rtol=2e-3, atol=1e-3)

    print("KERNEL_OK")
</pallas_src>

<mosaic_0001>
module attributes {stable_mosaic.version = 11 : i64} {
  func.func @_matmul_bias_kernel(%arg0: i32, %arg1: i32, %arg2: i32, %arg3: memref<16x128xf32, #tpu.memory_space<vmem>>, %arg4: memref<128x128xf32, #tpu.memory_space<vmem>>, %arg5: memref<1x128xf32, #tpu.memory_space<vmem>>, %arg6: memref<16x128xf32, #tpu.memory_space<vmem>>, %arg7: memref<16x128xf32, #tpu.memory_space<vmem>>) attributes {dimension_semantics = [#tpu.dimension_semantics<parallel>, #tpu.dimension_semantics<parallel>, #tpu.dimension_semantics<arbitrary>], iteration_bounds = array<i64: 1, 1, 1>, scalar_prefetch = 0 : i64, scratch_operands = 1 : i64, tpu.core_type = #tpu.core_type<tc>, window_params = [{transform_indices = @transform_0, window_bounds = array<i64: 16, 128>}, {transform_indices = @transform_1, window_bounds = array<i64: 128, 128>}, {transform_indices = @transform_2, window_bounds = array<i64: 1, 128>}, {transform_indices = @transform_3, window_bounds = array<i64: 16, 128>}]} {
    %c0_i32 = arith.constant 0 : i32
    %0 = arith.cmpi eq, %arg2, %c0_i32 : i32
    %1 = arith.extui %0 : i1 to i32
    %c0_i32_0 = arith.constant 0 : i32
    %2 = arith.cmpi ne, %1, %c0_i32_0 : i32
    scf.if %2 {
      %cst_10 = arith.constant 0.000000e+00 : f32
      %12 = vector.broadcast %cst_10 : f32 to vector<16x128xf32>
      %c0_11 = arith.constant 0 : index
      %c0_12 = arith.constant 0 : index
      %13 = vector.load %arg7[%c0_11, %c0_12] : memref<16x128xf32, #tpu.memory_space<vmem>>, vector<16x128xf32>
      tpu.vector_store %arg7[%c0_11, %c0_12], %12 {strides = array<i32>} : memref<16x128xf32, #tpu.memory_space<vmem>>, vector<16x128xf32>,
    } else {
    }
    %c0 = arith.constant 0 : index
    %c0_1 = arith.constant 0 : index
    %3 = vector.load %arg7[%c0, %c0_1] : memref<16x128xf32, #tpu.memory_space<vmem>>, vector<16x128xf32>
    %c0_2 = arith.constant 0 : index
    %c0_3 = arith.constant 0 : index
    %4 = vector.load %arg3[%c0_2, %c0_3] : memref<16x128xf32, #tpu.memory_space<vmem>>, vector<16x128xf32>
    %c0_4 = arith.constant 0 : index
    %c0_5 = arith.constant 0 : index
    %5 = vector.load %arg4[%c0_4, %c0_5] : memref<128x128xf32, #tpu.memory_space<vmem>>, vector<128x128xf32>
    %cst = arith.constant dense<0.000000e+00> : vector<16x128xf32>
    %6 = tpu.matmul %4, %5, %cst {dimension_numbers = #tpu.dot_dimension_numbers<[1], [0], [0], [1], [0, 0, 1, 1], [], []>} : vector<16x128xf32>, vector<128x128xf32>, vector<16x128xf32> -> vector<16x128xf32>
    %7 = arith.addf %3, %6 : vector<16x128xf32>
    %c0_6 = arith.constant 0 : index
    %c0_7 = arith.constant 0 : index
    %8 = vector.load %arg7[%c0_6, %c0_7] : memref<16x128xf32, #tpu.memory_space<vmem>>, vector<16x128xf32>
    tpu.vector_store %arg7[%c0_6, %c0_7], %7 {strides = array<i32>} : memref<16x128xf32, #tpu.memory_space<vmem>>, vector<16x128xf32>,
    %c0_i32_8 = arith.constant 0 : i32
    %9 = arith.cmpi eq, %arg2, %c0_i32_8 : i32
    %10 = arith.extui %9 : i1 to i32
    %c0_i32_9 = arith.constant 0 : i32
    %11 = arith.cmpi ne, %10, %c0_i32_9 : i32
    scf.if %11 {
      %c0_10 = arith.constant 0 : index
      %c0_11 = arith.constant 0 : index
      %12 = vector.load %arg7[%c0_10, %c0_11] : memref<16x128xf32, #tpu.memory_space<vmem>>, vector<16x128xf32>
      %c0_12 = arith.constant 0 : index
      %c0_13 = arith.constant 0 : index
      %13 = vector.load %arg5[%c0_12, %c0_13] : memref<1x128xf32, #tpu.memory_space<vmem>>, vector<1x128xf32>
      %14 = vector.broadcast %13 : vector<1x128xf32> to vector<16x128xf32>
      %15 = arith.addf %12, %14 : vector<16x128xf32>
      %c0_14 = arith.constant 0 : index
      %c0_15 = arith.constant 0 : index
      %16 = vector.load %arg6[%c0_14, %c0_15] : memref<16x128xf32, #tpu.memory_space<vmem>>, vector<16x128xf32>
      tpu.vector_store %arg6[%c0_14, %c0_15], %15 {strides = array<i32>} : memref<16x128xf32, #tpu.memory_space<vmem>>, vector<16x128xf32>,
    } else {
    }
    return
  }
  func.func @transform_0(%arg0: i32, %arg1: i32, %arg2: i32) -> (i32, i32) {
    %c0_i32 = arith.constant 0 : i32
    return %arg0, %arg2 : i32, i32
  }
  func.func @transform_1(%arg0: i32, %arg1: i32, %arg2: i32) -> (i32, i32) {
    %c0_i32 = arith.constant 0 : i32
    return %arg2, %arg1 : i32, i32
  }
  func.func @transform_2(%arg0: i32, %arg1: i32, %arg2: i32) -> (i32, i32) {
    %c0_i32 = arith.constant 0 : i32
    %c0_i32_0 = arith.constant 0 : i32
    return %c0_i32, %arg1 : i32, i32
  }
  func.func @transform_3(%arg0: i32, %arg1: i32, %arg2: i32) -> (i32, i32) {
    %c0_i32 = arith.constant 0 : i32
    return %arg0, %arg1 : i32, i32
  }
}

module attributes {stable_mosaic.version = 11 : i64} {
  func.func @_flash_kernel(%arg0: i32, %arg1: i32, %arg2: i32, %arg3: memref<1x8x32xf32, #tpu.memory_space<vmem>>, %arg4: memref<1x8x16xf32, #tpu.memory_space<vmem>>, %arg5: memref<1x8x16xf32, #tpu.memory_space<vmem>>, %arg6: memref<1x8x32xf32, #tpu.memory_space<vmem>>, %arg7: memref<4x8x1xf32, #tpu.memory_space<vmem>>, %arg8: memref<4x8x1xf32, #tpu.memory_space<vmem>>, %arg9: memref<4x8x8xf32, #tpu.memory_space<vmem>>) attributes {dimension_semantics = [#tpu.dimension_semantics<parallel>, #tpu.dimension_semantics<parallel>, #tpu.dimension_semantics<arbitrary>], iteration_bounds = array<i64: 2, 1, 1>, scalar_prefetch = 0 : i64, scratch_operands = 3 : i64, tpu.core_type = #tpu.core_type<tc>, window_params = [{transform_indices = @transform_0, window_bounds = array<i64: 1, 8, 32>}, {transform_indices = @transform_1, window_bounds = array<i64: 1, 8, 16>}, {transform_indices = @transform_2, window_bounds = array<i64: 1, 8, 16>}, {transform_indices = @transform_3, window_bounds = array<i64: 1, 8, 32>}]} {
    %c0_i32 = arith.constant 0 : i32
    %0 = arith.cmpi eq, %arg2, %c0_i32 : i32
    %1 = arith.extui %0 : i1 to i32
    %c0_i32_0 = arith.constant 0 : i32
    %2 = arith.cmpi ne, %1, %c0_i32_0 : i32
    scf.if %2 {
      %cst_111 = arith.constant 0xFF800000 : f32
      %158 = vector.broadcast %cst_111 : f32 to vector<4x8x1xf32>
      %c0_112 = arith.constant 0 : index
      %c0_113 = arith.constant 0 : index
      %c0_114 = arith.constant 0 : index
      %159 = vector.load %arg7[%c0_112, %c0_113, %c0_114] : memref<4x8x1xf32, #tpu.memory_space<vmem>>, vector<4x8x1xf32>
      tpu.vector_store %arg7[%c0_112, %c0_113, %c0_114], %158 {strides = array<i32>} : memref<4x8x1xf32, #tpu.memory_space<vmem>>, vector<4x8x1xf32>,
      %cst_115 = arith.constant 0.000000e+00 : f32
      %160 = vector.broadcast %cst_115 : f32 to vector<4x8x1xf32>
      %c0_116 = arith.constant 0 : index
      %c0_117 = arith.constant 0 : index
      %c0_118 = arith.constant 0 : index
      %161 = vector.load %arg8[%c0_116, %c0_117, %c0_118] : memref<4x8x1xf32, #tpu.memory_space<vmem>>, vector<4x8x1xf32>
      tpu.vector_store %arg8[%c0_116, %c0_117, %c0_118], %160 {strides = array<i32>} : memref<4x8x1xf32, #tpu.memory_space<vmem>>, vector<4x8x1xf32>,
      %cst_119 = arith.constant 0.000000e+00 : f32
      %162 = vector.broadcast %cst_119 : f32 to vector<4x8x8xf32>
      %c0_120 = arith.constant 0 : index
      %c0_121 = arith.constant 0 : index
      %c0_122 = arith.constant 0 : index
      %163 = vector.load %arg9[%c0_120, %c0_121, %c0_122] : memref<4x8x8xf32, #tpu.memory_space<vmem>>, vector<4x8x8xf32>
      tpu.vector_store %arg9[%c0_120, %c0_121, %c0_122], %162 {strides = array<i32>} : memref<4x8x8xf32, #tpu.memory_space<vmem>>, vector<4x8x8xf32>,
    } else {
    }
    %c0 = arith.constant 0 : index
    %c0_1 = arith.constant 0 : index
    %c0_2 = arith.constant 0 : index
    %3 = vector.load %arg4[%c0, %c0_1, %c0_2] : memref<1x8x16xf32, #tpu.memory_space<vmem>>, vector<1x8x8xf32>
    %4 = vector.shape_cast %3 : vector<1x8x8xf32> to vector<8x8xf32>
    %c0_3 = arith.constant 0 : index
    %c0_4 = arith.constant 0 : index
    %c0_5 = arith.constant 0 : index
    %5 = vector.load %arg5[%c0_3, %c0_4, %c0_5] : memref<1x8x16xf32, #tpu.memory_space<vmem>>, vector<1x8x8xf32>
    %6 = vector.shape_cast %5 : vector<1x8x8xf32> to vector<8x8xf32>
    %c0_6 = arith.constant 0 : index
    %c0_7 = arith.constant 0 : index
    %c0_8 = arith.constant 0 : index
    %7 = vector.load %arg3[%c0_6, %c0_7, %c0_8] : memref<1x8x32xf32, #tpu.memory_space<vmem>>, vector<1x8x8xf32>
    %8 = vector.shape_cast %7 : vector<1x8x8xf32> to vector<8x8xf32>
    %cst = arith.constant 0.353553385 : f32
    %9 = vector.broadcast %cst : f32 to vector<8x8xf32>
    %10 = arith.mulf %8, %9 : vector<8x8xf32>
    %cst_9 = arith.constant dense<0.000000e+00> : vector<8x8xf32>
    %11 = tpu.matmul %10, %4, %cst_9 {dimension_numbers = #tpu.dot_dimension_numbers<[1], [1], [0], [0], [0, 0, 1, 0], [], []>} : vector<8x8xf32>, vector<8x8xf32>, vector<8x8xf32> -> vector<8x8xf32>
    %c0_10 = arith.constant 0 : index
    %c0_11 = arith.constant 0 : index
    %c0_12 = arith.constant 0 : index
    %12 = vector.load %arg7[%c0_10, %c0_11, %c0_12] : memref<4x8x1xf32, #tpu.memory_space<vmem>>, vector<1x8x1xf32>
    %13 = vector.shape_cast %12 : vector<1x8x1xf32> to vector<8x1xf32>
    %cst_13 = arith.constant dense<0xFF800000> : vector<8xf32>
    %14 = vector.multi_reduction <maximumf>, %11, %cst_13 [1] : vector<8x8xf32> to vector<8xf32>
    %15 = vector.shape_cast %14 : vector<8xf32> to vector<8x1xf32>
    %16 = arith.maximumf %13, %15 : vector<8x1xf32>
    %17 = arith.subf %13, %16 : vector<8x1xf32>
    %18 = math.exp %17 : vector<8x1xf32>
    %19 = vector.broadcast %16 : vector<8x1xf32> to vector<8x8xf32>
    %20 = arith.subf %11, %19 : vector<8x8xf32>
    %21 = math.exp %20 : vector<8x8xf32>
    %c0_14 = arith.constant 0 : index
    %c0_15 = arith.constant 0 : index
    %c0_16 = arith.constant 0 : index
    %22 = vector.load %arg8[%c0_14, %c0_15, %c0_16] : memref<4x8x1xf32, #tpu.memory_space<vmem>>, vector<1x8x1xf32>
    %23 = vector.shape_cast %22 : vector<1x8x1xf32> to vector<8x1xf32>
    %24 = arith.mulf %18, %23 : vector<8x1xf32>
    %cst_17 = arith.constant dense<0.000000e+00> : vector<8xf32>
    %25 = vector.multi_reduction <add>, %21, %cst_17 [1] : vector<8x8xf32> to vector<8xf32>
    %26 = vector.shape_cast %25 : vector<8xf32> to vector<8x1xf32>
    %27 = arith.addf %24, %26 : vector<8x1xf32>
    %c0_18 = arith.constant 0 : index
    %c0_19 = arith.constant 0 : index
    %c0_20 = arith.constant 0 : index
    %28 = vector.load %arg8[%c0_18, %c0_19, %c0_20] : memref<4x8x1xf32, #tpu.memory_space<vmem>>, vector<1x8x1xf32>
    %29 = vector.shape_cast %28 : vector<1x8x1xf32> to vector<8x1xf32>
    %30 = vector.shape_cast %27 : vector<8x1xf32> to vector<1x8x1xf32>
    tpu.vector_store %arg8[%c0_18, %c0_19, %c0_20], %30 {strides = array<i32>} : memref<4x8x1xf32, #tpu.memory_space<vmem>>, vector<1x8x1xf32>,
    %c0_21 = arith.constant 0 : index
    %c0_22 = arith.constant 0 : index
    %c0_23 = arith.constant 0 : index
    %31 = vector.load %arg9[%c0_21, %c0_22, %c0_23] : memref<4x8x8xf32, #tpu.memory_space<vmem>>, vector<1x8x8xf32>
    %32 = vector.shape_cast %31 : vector<1x8x8xf32> to vector<8x8xf32>
    %33 = vector.broadcast %18 : vector<8x1xf32> to vector<8x8xf32>
    %34 = arith.mulf %33, %32 : vector<8x8xf32>
    %cst_24 = arith.constant dense<0.000000e+00> : vector<8x8xf32>
    %35 = tpu.matmul %21, %6, %cst_24 {dimension_numbers = #tpu.dot_dimension_numbers<[1], [0], [0], [1], [0, 0, 1, 1], [], []>} : vector<8x8xf32>, vector<8x8xf32>, vector<8x8xf32> -> vector<8x8xf32>
    %36 = arith.addf %34, %35 : vector<8x8xf32>
    %c0_25 = arith.constant 0 : index
    %c0_26 = arith.constant 0 : index
    %c0_27 = arith.constant 0 : index
    %37 = vector.load %arg9[%c0_25, %c0_26, %c0_27] : memref<4x8x8xf32, #tpu.memory_space<vmem>>, vector<1x8x8xf32>
    %38 = vector.shape_cast %37 : vector<1x8x8xf32> to vector<8x8xf32>
    %39 = vector.shape_cast %36 : vector<8x8xf32> to vector<1x8x8xf32>
    tpu.vector_store %arg9[%c0_25, %c0_26, %c0_27], %39 {strides = array<i32>} : memref<4x8x8xf32, #tpu.memory_space<vmem>>, vector<1x8x8xf32>,
    %c0_28 = arith.constant 0 : index
    %c0_29 = arith.constant 0 : index
    %c0_30 = arith.constant 0 : index
    %40 = vector.load %arg7[%c0_28, %c0_29, %c0_30] : memref<4x8x1xf32, #tpu.memory_space<vmem>>, vector<1x8x1xf32>
    %41 = vector.shape_cast %40 : vector<1x8x1xf32> to vector<8x1xf32>
    %42 = vector.shape_cast %16 : vector<8x1xf32> to vector<1x8x1xf32>
    tpu.vector_store %arg7[%c0_28, %c0_29, %c0_30], %42 {strides = array<i32>} : memref<4x8x1xf32, #tpu.memory_space<vmem>>, vector<1x8x1xf32>,
    %c0_31 = arith.constant 0 : index
    %c0_32 = arith.constant 0 : index
    %c8 = arith.constant 8 : index
    %43 = vector.load %arg3[%c0_31, %c0_32, %c8] : memref<1x8x32xf32, #tpu.memory_space<vmem>>, vector<1x8x8xf32>
    %44 = vector.shape_cast %43 : vector<1x8x8xf32> to vector<8x8xf32>
    %cst_33 = arith.constant 0.353553385 : f32
    %45 = vector.broadcast %cst_33 : f32 to vector<8x8xf32>
    %46 = arith.mulf %44, %45 : vector<8x8xf32>
    %cst_34 = arith.constant dense<0.000000e+00> : vector<8x8xf32>
    %47 = tpu.matmul %46, %4, %cst_34 {dimension_numbers = #tpu.dot_dimension_numbers<[1], [1], [0], [0], [0, 0, 1, 0], [], []>} : vector<8x8xf32>, vector<8x8xf32>, vector<8x8xf32> -> vector<8x8xf32>
    %c1 = arith.constant 1 : index
    %c0_35 = arith.constant 0 : index
    %c0_36 = arith.constant 0 : index
    %48 = vector.load %arg7[%c1, %c0_35, %c0_36] : memref<4x8x1xf32, #tpu.memory_space<vmem>>, vector<1x8x1xf32>
    %49 = vector.shape_cast %48 : vector<1x8x1xf32> to vector<8x1xf32>
    %cst_37 = arith.constant dense<0xFF800000> : vector<8xf32>
    %50 = vector.multi_reduction <maximumf>, %47, %cst_37 [1] : vector<8x8xf32> to vector<8xf32>
    %51 = vector.shape_cast %50 : vector<8xf32> to vector<8x1xf32>
    %52 = arith.maximumf %49, %51 : vector<8x1xf32>
    %53 = arith.subf %49, %52 : vector<8x1xf32>
    %54 = math.exp %53 : vector<8x1xf32>
    %55 = vector.broadcast %52 : vector<8x1xf32> to vector<8x8xf32>
    %56 = arith.subf %47, %55 : vector<8x8xf32>
    %57 = math.exp %56 : vector<8x8xf32>
    %c1_38 = arith.constant 1 : index
    %c0_39 = arith.constant 0 : index
    %c0_40 = arith.constant 0 : index
    %58 = vector.load %arg8[%c1_38, %c0_39, %c0_40] : memref<4x8x1xf32, #tpu.memory_space<vmem>>, vector<1x8x1xf32>
    %59 = vector.shape_cast %58 : vector<1x8x1xf32> to vector<8x1xf32>
    %60 = arith.mulf %54, %59 : vector<8x1xf32>
    %cst_41 = arith.constant dense<0.000000e+00> : vector<8xf32>
    %61 = vector.multi_reduction <add>, %57, %cst_41 [1] : vector<8x8xf32> to vector<8xf32>
    %62 = vector.shape_cast %61 : vector<8xf32> to vector<8x1xf32>
    %63 = arith.addf %60, %62 : vector<8x1xf32>
    %c1_42 = arith.constant 1 : index
    %c0_43 = arith.constant 0 : index
    %c0_44 = arith.constant 0 : index
    %64 = vector.load %arg8[%c1_42, %c0_43, %c0_44] : memref<4x8x1xf32, #tpu.memory_space<vmem>>, vector<1x8x1xf32>
    %65 = vector.shape_cast %64 : vector<1x8x1xf32> to vector<8x1xf32>
    %66 = vector.shape_cast %63 : vector<8x1xf32> to vector<1x8x1xf32>
    tpu.vector_store %arg8[%c1_42, %c0_43, %c0_44], %66 {strides = array<i32>} : memref<4x8x1xf32, #tpu.memory_space<vmem>>, vector<1x8x1xf32>,
    %c1_45 = arith.constant 1 : index
    %c0_46 = arith.constant 0 : index
    %c0_47 = arith.constant 0 : index
    %67 = vector.load %arg9[%c1_45, %c0_46, %c0_47] : memref<4x8x8xf32, #tpu.memory_space<vmem>>, vector<1x8x8xf32>
    %68 = vector.shape_cast %67 : vector<1x8x8xf32> to vector<8x8xf32>
    %69 = vector.broadcast %54 : vector<8x1xf32> to vector<8x8xf32>
    %70 = arith.mulf %69, %68 : vector<8x8xf32>
    %cst_48 = arith.constant dense<0.000000e+00> : vector<8x8xf32>
    %71 = tpu.matmul %57, %6, %cst_48 {dimension_numbers = #tpu.dot_dimension_numbers<[1], [0], [0], [1], [0, 0, 1, 1], [], []>} : vector<8x8xf32>, vector<8x8xf32>, vector<8x8xf32> -> vector<8x8xf32>
    %72 = arith.addf %70, %71 : vector<8x8xf32>
    %c1_49 = arith.constant 1 : index
    %c0_50 = arith.constant 0 : index
    %c0_51 = arith.constant 0 : index
    %73 = vector.load %arg9[%c1_49, %c0_50, %c0_51] : memref<4x8x8xf32, #tpu.memory_space<vmem>>, vector<1x8x8xf32>
    %74 = vector.shape_cast %73 : vector<1x8x8xf32> to vector<8x8xf32>
    %75 = vector.shape_cast %72 : vector<8x8xf32> to vector<1x8x8xf32>
    tpu.vector_store %arg9[%c1_49, %c0_50, %c0_51], %75 {strides = array<i32>} : memref<4x8x8xf32, #tpu.memory_space<vmem>>, vector<1x8x8xf32>,
    %c1_52 = arith.constant 1 : index
    %c0_53 = arith.constant 0 : index
    %c0_54 = arith.constant 0 : index
    %76 = vector.load %arg7[%c1_52, %c0_53, %c0_54] : memref<4x8x1xf32, #tpu.memory_space<vmem>>, vector<1x8x1xf32>
    %77 = vector.shape_cast %76 : vector<1x8x1xf32> to vector<8x1xf32>
    %78 = vector.shape_cast %52 : vector<8x1xf32> to vector<1x8x1xf32>
    tpu.vector_store %arg7[%c1_52, %c0_53, %c0_54], %78 {strides = array<i32>} : memref<4x8x1xf32, #tpu.memory_space<vmem>>, vector<1x8x1xf32>,
    %c0_55 = arith.constant 0 : index
    %c0_56 = arith.constant 0 : index
    %c8_57 = arith.constant 8 : index
    %79 = vector.load %arg4[%c0_55, %c0_56, %c8_57] : memref<1x8x16xf32, #tpu.memory_space<vmem>>, vector<1x8x8xf32>
    %80 = vector.shape_cast %79 : vector<1x8x8xf32> to vector<8x8xf32>
    %c0_58 = arith.constant 0 : index
    %c0_59 = arith.constant 0 : index
    %c8_60 = arith.constant 8 : index
    %81 = vector.load %arg5[%c0_58, %c0_59, %c8_60] : memref<1x8x16xf32, #tpu.memory_space<vmem>>, vector<1x8x8xf32>
    %82 = vector.shape_cast %81 : vector<1x8x8xf32> to vector<8x8xf32>
    %c0_61 = arith.constant 0 : index
    %c0_62 = arith.constant 0 : index
    %c16 = arith.constant 16 : index
    %83 = vector.load %arg3[%c0_61, %c0_62, %c16] : memref<1x8x32xf32, #tpu.memory_space<vmem>>, vector<1x8x8xf32>
    %84 = vector.shape_cast %83 : vector<1x8x8xf32> to vector<8x8xf32>
    %cst_63 = arith.constant 0.353553385 : f32
    %85 = vector.broadcast %cst_63 : f32 to vector<8x8xf32>
    %86 = arith.mulf %84, %85 : vector<8x8xf32>
    %cst_64 = arith.constant dense<0.000000e+00> : vector<8x8xf32>
    %87 = tpu.matmul %86, %80, %cst_64 {dimension_numbers = #tpu.dot_dimension_numbers<[1], [1], [0], [0], [0, 0, 1, 0], [], []>} : vector<8x8xf32>, vector<8x8xf32>, vector<8x8xf32> -> vector<8x8xf32>
    %c2 = arith.constant 2 : index
    %c0_65 = arith.constant 0 : index
    %c0_66 = arith.constant 0 : index
    %88 = vector.load %arg7[%c2, %c0_65, %c0_66] : memref<4x8x1xf32, #tpu.memory_space<vmem>>, vector<1x8x1xf32>
    %89 = vector.shape_cast %88 : vector<1x8x1xf32> to vector<8x1xf32>
    %cst_67 = arith.constant dense<0xFF800000> : vector<8xf32>
    %90 = vector.multi_reduction <maximumf>, %87, %cst_67 [1] : vector<8x8xf32> to vector<8xf32>
    %91 = vector.shape_cast %90 : vector<8xf32> to vector<8x1xf32>
    %92 = arith.maximumf %89, %91 : vector<8x1xf32>
    %93 = arith.subf %89, %92 : vector<8x1xf32>
    %94 = math.exp %93 : vector<8x1xf32>
    %95 = vector.broadcast %92 : vector<8x1xf32> to vector<8x8xf32>
    %96 = arith.subf %87, %95 : vector<8x8xf32>
    %97 = math.exp %96 : vector<8x8xf32>
    %c2_68 = arith.constant 2 : index
    %c0_69 = arith.constant 0 : index
    %c0_70 = arith.constant 0 : index
    %98 = vector.load %arg8[%c2_68, %c0_69, %c0_70] : memref<4x8x1xf32, #tpu.memory_space<vmem>>, vector<1x8x1xf32>
    %99 = vector.shape_cast %98 : vector<1x8x1xf32> to vector<8x1xf32>
    %100 = arith.mulf %94, %99 : vector<8x1xf32>
    %cst_71 = arith.constant dense<0.000000e+00> : vector<8xf32>
    %101 = vector.multi_reduction <add>, %97, %cst_71 [1] : vector<8x8xf32> to vector<8xf32>
    %102 = vector.shape_cast %101 : vector<8xf32> to vector<8x1xf32>
    %103 = arith.addf %100, %102 : vector<8x1xf32>
    %c2_72 = arith.constant 2 : index
    %c0_73 = arith.constant 0 : index
    %c0_74 = arith.constant 0 : index
    %104 = vector.load %arg8[%c2_72, %c0_73, %c0_74] : memref<4x8x1xf32, #tpu.memory_space<vmem>>, vector<1x8x1xf32>
    %105 = vector.shape_cast %104 : vector<1x8x1xf32> to vector<8x1xf32>
    %106 = vector.shape_cast %103 : vector<8x1xf32> to vector<1x8x1xf32>
    tpu.vector_store %arg8[%c2_72, %c0_73, %c0_74], %106 {strides = array<i32>} : memref<4x8x1xf32, #tpu.memory_space<vmem>>, vector<1x8x1xf32>,
    %c2_75 = arith.constant 2 : index
    %c0_76 = arith.constant 0 : index
    %c0_77 = arith.constant 0 : index
    %107 = vector.load %arg9[%c2_75, %c0_76, %c0_77] : memref<4x8x8xf32, #tpu.memory_space<vmem>>, vector<1x8x8xf32>
    %108 = vector.shape_cast %107 : vector<1x8x8xf32> to vector<8x8xf32>
    %109 = vector.broadcast %94 : vector<8x1xf32> to vector<8x8xf32>
    %110 = arith.mulf %109, %108 : vector<8x8xf32>
    %cst_78 = arith.constant dense<0.000000e+00> : vector<8x8xf32>
    %111 = tpu.matmul %97, %82, %cst_78 {dimension_numbers = #tpu.dot_dimension_numbers<[1], [0], [0], [1], [0, 0, 1, 1], [], []>} : vector<8x8xf32>, vector<8x8xf32>, vector<8x8xf32> -> vector<8x8xf32>
    %112 = arith.addf %110, %111 : vector<8x8xf32>
    %c2_79 = arith.constant 2 : index
    %c0_80 = arith.constant 0 : index
    %c0_81 = arith.constant 0 : index
    %113 = vector.load %arg9[%c2_79, %c0_80, %c0_81] : memref<4x8x8xf32, #tpu.memory_space<vmem>>, vector<1x8x8xf32>
    %114 = vector.shape_cast %113 : vector<1x8x8xf32> to vector<8x8xf32>
    %115 = vector.shape_cast %112 : vector<8x8xf32> to vector<1x8x8xf32>
    tpu.vector_store %arg9[%c2_79, %c0_80, %c0_81], %115 {strides = array<i32>} : memref<4x8x8xf32, #tpu.memory_space<vmem>>, vector<1x8x8xf32>,
    %c2_82 = arith.constant 2 : index
    %c0_83 = arith.constant 0 : index
    %c0_84 = arith.constant 0 : index
    %116 = vector.load %arg7[%c2_82, %c0_83, %c0_84] : memref<4x8x1xf32, #tpu.memory_space<vmem>>, vector<1x8x1xf32>
    %117 = vector.shape_cast %116 : vector<1x8x1xf32> to vector<8x1xf32>
    %118 = vector.shape_cast %92 : vector<8x1xf32> to vector<1x8x1xf32>
    tpu.vector_store %arg7[%c2_82, %c0_83, %c0_84], %118 {strides = array<i32>} : memref<4x8x1xf32, #tpu.memory_space<vmem>>, vector<1x8x1xf32>,
    %c0_85 = arith.constant 0 : index
    %c0_86 = arith.constant 0 : index
    %c24 = arith.constant 24 : index
    %119 = vector.load %arg3[%c0_85, %c0_86, %c24] : memref<1x8x32xf32, #tpu.memory_space<vmem>>, vector<1x8x8xf32>
    %120 = vector.shape_cast %119 : vector<1x8x8xf32> to vector<8x8xf32>
    %cst_87 = arith.constant 0.353553385 : f32
    %121 = vector.broadcast %cst_87 : f32 to vector<8x8xf32>
    %122 = arith.mulf %120, %121 : vector<8x8xf32>
    %cst_88 = arith.constant dense<0.000000e+00> : vector<8x8xf32>
    %123 = tpu.matmul %122, %80, %cst_88 {dimension_numbers = #tpu.dot_dimension_numbers<[1], [1], [0], [0], [0, 0, 1, 0], [], []>} : vector<8x8xf32>, vector<8x8xf32>, vector<8x8xf32> -> vector<8x8xf32>
    %c3 = arith.constant 3 : index
    %c0_89 = arith.constant 0 : index
    %c0_90 = arith.constant 0 : index
    %124 = vector.load %arg7[%c3, %c0_89, %c0_90] : memref<4x8x1xf32, #tpu.memory_space<vmem>>, vector<1x8x1xf32>
    %125 = vector.shape_cast %124 : vector<1x8x1xf32> to vector<8x1xf32>
    %cst_91 = arith.constant dense<0xFF800000> : vector<8xf32>
    %126 = vector.multi_reduction <maximumf>, %123, %cst_91 [1] : vector<8x8xf32> to vector<8xf32>
    %127 = vector.shape_cast %126 : vector<8xf32> to vector<8x1xf32>
    %128 = arith.maximumf %125, %127 : vector<8x1xf32>
    %129 = arith.subf %125, %128 : vector<8x1xf32>
    %130 = math.exp %129 : vector<8x1xf32>
    %131 = vector.broadcast %128 : vector<8x1xf32> to vector<8x8xf32>
    %132 = arith.subf %123, %131 : vector<8x8xf32>
    %133 = math.exp %132 : vector<8x8xf32>
    %c3_92 = arith.constant 3 : index
    %c0_93 = arith.constant 0 : index
    %c0_94 = arith.constant 0 : index
    %134 = vector.load %arg8[%c3_92, %c0_93, %c0_94] : memref<4x8x1xf32, #tpu.memory_space<vmem>>, vector<1x8x1xf32>
    %135 = vector.shape_cast %134 : vector<1x8x1xf32> to vector<8x1xf32>
    %136 = arith.mulf %130, %135 : vector<8x1xf32>
    %cst_95 = arith.constant dense<0.000000e+00> : vector<8xf32>
    %137 = vector.multi_reduction <add>, %133, %cst_95 [1] : vector<8x8xf32> to vector<8xf32>
    %138 = vector.shape_cast %137 : vector<8xf32> to vector<8x1xf32>
    %139 = arith.addf %136, %138 : vector<8x1xf32>
    %c3_96 = arith.constant 3 : index
    %c0_97 = arith.constant 0 : index
    %c0_98 = arith.constant 0 : index
    %140 = vector.load %arg8[%c3_96, %c0_97, %c0_98] : memref<4x8x1xf32, #tpu.memory_space<vmem>>, vector<1x8x1xf32>
    %141 = vector.shape_cast %140 : vector<1x8x1xf32> to vector<8x1xf32>
    %142 = vector.shape_cast %139 : vector<8x1xf32> to vector<1x8x1xf32>
    tpu.vector_store %arg8[%c3_96, %c0_97, %c0_98], %142 {strides = array<i32>} : memref<4x8x1xf32, #tpu.memory_space<vmem>>, vector<1x8x1xf32>,
    %c3_99 = arith.constant 3 : index
    %c0_100 = arith.constant 0 : index
    %c0_101 = arith.constant 0 : index
    %143 = vector.load %arg9[%c3_99, %c0_100, %c0_101] : memref<4x8x8xf32, #tpu.memory_space<vmem>>, vector<1x8x8xf32>
    %144 = vector.shape_cast %143 : vector<1x8x8xf32> to vector<8x8xf32>
    %145 = vector.broadcast %130 : vector<8x1xf32> to vector<8x8xf32>
    %146 = arith.mulf %145, %144 : vector<8x8xf32>
    %cst_102 = arith.constant dense<0.000000e+00> : vector<8x8xf32>
    %147 = tpu.matmul %133, %82, %cst_102 {dimension_numbers = #tpu.dot_dimension_numbers<[1], [0], [0], [1], [0, 0, 1, 1], [], []>} : vector<8x8xf32>, vector<8x8xf32>, vector<8x8xf32> -> vector<8x8xf32>
    %148 = arith.addf %146, %147 : vector<8x8xf32>
    %c3_103 = arith.constant 3 : index
    %c0_104 = arith.constant 0 : index
    %c0_105 = arith.constant 0 : index
    %149 = vector.load %arg9[%c3_103, %c0_104, %c0_105] : memref<4x8x8xf32, #tpu.memory_space<vmem>>, vector<1x8x8xf32>
    %150 = vector.shape_cast %149 : vector<1x8x8xf32> to vector<8x8xf32>
    %151 = vector.shape_cast %148 : vector<8x8xf32> to vector<1x8x8xf32>
    tpu.vector_store %arg9[%c3_103, %c0_104, %c0_105], %151 {strides = array<i32>} : memref<4x8x8xf32, #tpu.memory_space<vmem>>, vector<1x8x8xf32>,
    %c3_106 = arith.constant 3 : index
    %c0_107 = arith.constant 0 : index
    %c0_108 = arith.constant 0 : index
    %152 = vector.load %arg7[%c3_106, %c0_107, %c0_108] : memref<4x8x1xf32, #tpu.memory_space<vmem>>, vector<1x8x1xf32>
    %153 = vector.shape_cast %152 : vector<1x8x1xf32> to vector<8x1xf32>
    %154 = vector.shape_cast %128 : vector<8x1xf32> to vector<1x8x1xf32>
    tpu.vector_store %arg7[%c3_106, %c0_107, %c0_108], %154 {strides = array<i32>} : memref<4x8x1xf32, #tpu.memory_space<vmem>>, vector<1x8x1xf32>,
    %c0_i32_109 = arith.constant 0 : i32
    %155 = arith.cmpi eq, %arg2, %c0_i32_109 : i32
    %156 = arith.extui %155 : i1 to i32
    %c0_i32_110 = arith.constant 0 : i32
    %157 = arith.cmpi ne, %156, %c0_i32_110 : i32
    scf.if %157 {
      %c0_111 = arith.constant 0 : index
      %c0_112 = arith.constant 0 : index
      %c0_113 = arith.constant 0 : index
      %158 = vector.load %arg8[%c0_111, %c0_112, %c0_113] : memref<4x8x1xf32, #tpu.memory_space<vmem>>, vector<1x8x1xf32>
      %159 = vector.shape_cast %158 : vector<1x8x1xf32> to vector<8x1xf32>
      %160 = tpu.reciprocal %159 {approx = true} : vector<8x1xf32> -> vector<8x1xf32>
      %c0_114 = arith.constant 0 : index
      %c0_115 = arith.constant 0 : index
      %c0_116 = arith.constant 0 : index
      %161 = vector.load %arg9[%c0_114, %c0_115, %c0_116] : memref<4x8x8xf32, #tpu.memory_space<vmem>>, vector<1x8x8xf32>
      %162 = vector.shape_cast %161 : vector<1x8x8xf32> to vector<8x8xf32>
      %163 = vector.broadcast %160 : vector<8x1xf32> to vector<8x8xf32>
      %164 = arith.mulf %162, %163 : vector<8x8xf32>
      %c1_117 = arith.constant 1 : index
      %c0_118 = arith.constant 0 : index
      %c0_119 = arith.constant 0 : index
      %165 = vector.load %arg8[%c1_117, %c0_118, %c0_119] : memref<4x8x1xf32, #tpu.memory_space<vmem>>, vector<1x8x1xf32>
      %166 = vector.shape_cast %165 : vector<1x8x1xf32> to vector<8x1xf32>
      %167 = tpu.reciprocal %166 {approx = true} : vector<8x1xf32> -> vector<8x1xf32>
      %c1_120 = arith.constant 1 : index
      %c0_121 = arith.constant 0 : index
      %c0_122 = arith.constant 0 : index
      %168 = vector.load %arg9[%c1_120, %c0_121, %c0_122] : memref<4x8x8xf32, #tpu.memory_space<vmem>>, vector<1x8x8xf32>
      %169 = vector.shape_cast %168 : vector<1x8x8xf32> to vector<8x8xf32>
      %170 = vector.broadcast %167 : vector<8x1xf32> to vector<8x8xf32>
      %171 = arith.mulf %169, %170 : vector<8x8xf32>
      %c2_123 = arith.constant 2 : index
      %c0_124 = arith.constant 0 : index
      %c0_125 = arith.constant 0 : index
      %172 = vector.load %arg8[%c2_123, %c0_124, %c0_125] : memref<4x8x1xf32, #tpu.memory_space<vmem>>, vector<1x8x1xf32>
      %173 = vector.shape_cast %172 : vector<1x8x1xf32> to vector<8x1xf32>
      %174 = tpu.reciprocal %173 {approx = true} : vector<8x1xf32> -> vector<8x1xf32>
      %c2_126 = arith.constant 2 : index
      %c0_127 = arith.constant 0 : index
      %c0_128 = arith.constant 0 : index
      %175 = vector.load %arg9[%c2_126, %c0_127, %c0_128] : memref<4x8x8xf32, #tpu.memory_space<vmem>>, vector<1x8x8xf32>
      %176 = vector.shape_cast %175 : vector<1x8x8xf32> to vector<8x8xf32>
      %177 = vector.broadcast %174 : vector<8x1xf32> to vector<8x8xf32>
      %178 = arith.mulf %176, %177 : vector<8x8xf32>
      %c3_129 = arith.constant 3 : index
      %c0_130 = arith.constant 0 : index
      %c0_131 = arith.constant 0 : index
      %179 = vector.load %arg8[%c3_129, %c0_130, %c0_131] : memref<4x8x1xf32, #tpu.memory_space<vmem>>, vector<1x8x1xf32>
      %180 = vector.shape_cast %179 : vector<1x8x1xf32> to vector<8x1xf32>
      %181 = tpu.reciprocal %180 {approx = true} : vector<8x1xf32> -> vector<8x1xf32>
      %c3_132 = arith.constant 3 : index
      %c0_133 = arith.constant 0 : index
      %c0_134 = arith.constant 0 : index
      %182 = vector.load %arg9[%c3_132, %c0_133, %c0_134] : memref<4x8x8xf32, #tpu.memory_space<vmem>>, vector<1x8x8xf32>
      %183 = vector.shape_cast %182 : vector<1x8x8xf32> to vector<8x8xf32>
      %184 = vector.broadcast %181 : vector<8x1xf32> to vector<8x8xf32>
      %185 = arith.mulf %183, %184 : vector<8x8xf32>
      %186 = tpu.concatenate %164, %171, %178, %185 in 1 : vector<8x8xf32>, vector<8x8xf32>, vector<8x8xf32>, vector<8x8xf32> -> vector<8x32xf32>
      %c0_135 = arith.constant 0 : index
      %c0_136 = arith.constant 0 : index
      %c0_137 = arith.constant 0 : index
      %187 = vector.load %arg6[%c0_135, %c0_136, %c0_137] : memref<1x8x32xf32, #tpu.memory_space<vmem>>, vector<1x8x32xf32>
      %188 = vector.shape_cast %187 : vector<1x8x32xf32> to vector<8x32xf32>
      %189 = vector.shape_cast %186 : vector<8x32xf32> to vector<1x8x32xf32>
      tpu.vector_store %arg6[%c0_135, %c0_136, %c0_137], %189 {strides = array<i32>} : memref<1x8x32xf32, #tpu.memory_space<vmem>>, vector<1x8x32xf32>,
    } else {
    }
    return
  }
  func.func @transform_0(%arg0: i32, %arg1: i32, %arg2: i32) -> (i32, i32, i32) {
    %c0_i32 = arith.constant 0 : i32
    %c0_i32_0 = arith.constant 0 : i32
    return %arg0, %arg1, %c0_i32 : i32, i32, i32
  }
  func.func @transform_1(%arg0: i32, %arg1: i32, %arg2: i32) -> (i32, i32, i32) {
    %c0_i32 = arith.constant 0 : i32
    %c0_i32_0 = arith.constant 0 : i32
    return %arg0, %arg2, %c0_i32 : i32, i32, i32
  }
  func.func @transform_2(%arg0: i32, %arg1: i32, %arg2: i32) -> (i32, i32, i32) {
    %c0_i32 = arith.constant 0 : i32
    %c0_i32_0 = arith.constant 0 : i32
    return %arg0, %arg2, %c0_i32 : i32, i32, i32
  }
  func.func @transform_3(%arg0: i32, %arg1: i32, %arg2: i32) -> (i32, i32, i32) {
    %c0_i32 = arith.constant 0 : i32
    %c0_i32_0 = arith.constant 0 : i32
    return %arg0, %arg1, %c0_i32 : i32, i32, i32
  }
}

</mosaic_0001>

<bundles_post_ra>
// kernel: _mha_forward.3
= control target key start
LH: loop header
LB: loop body
LE: loop exit
PB: predicated region body
PF: predicated region fallthrough
CT: control target
= control target key end

     0   :  { %s308_s1 = inlined_call_operand.vmem [shape: f32[128,128], index: 1, kind: input, shape index: {}]   ;;  %s309_s0 = inlined_call_operand.vmem [shape: f32[16,128], index: 0, kind: input, shape index: {}]   ;;  %s310_s2 = inlined_call_operand.vmem [shape: f32[1,128], index: 2, kind: input, shape index: {}]   ;;  %s311_s3 = inlined_call_operand.vmem [shape: f32[16,128], index: 3, kind: output, shape index: {}]  }
   0x1   :  { %v24_v0 = vld [vmem:[%s308_s1] sm:$0xff]  ;;  %v25_v1 = vld [vmem:[%s308_s1 + $0x8] sm:$0xff]  ;;  %v26_v2 = vld [vmem:[%s308_s1 + $0x10] sm:$0xff] }
   0x2   :  { %v193_v3 = vpack.c.bf16 %v25_v1, %v24_v0  ;;  %v27_v4 = vld [vmem:[%s308_s1 + $0x18] sm:$0xff]  ;;  %v28_v6 = vld [vmem:[%s308_s1 + $0x20] sm:$0xff]  ;;  %v29_v7 = vld [vmem:[%s308_s1 + $0x28] sm:$0xff] }
   0x3   :  { %v197_v5 = vpack.c.bf16 %v27_v4, %v26_v2  ;;  %v201_v8 = vpack.c.bf16 %v29_v7, %v28_v6  ;;  %v22_v9 = vld [vmem:[%s309_s0] sm:$0xff]  ;;  %v30_v10 = vld [vmem:[%s308_s1 + $0x30] sm:$0xff]  ;;  %v31_v11 = vld [vmem:[%s308_s1 + $0x38] sm:$0xff] }
   0x4   :  { %194 = vmatprep.subr.bf16.mxu0 %v193_v3  ;;  %190 = vmatprep.mubr.f32.mxu0 %v22_v9  ;;  %v205_v12 = vpack.c.bf16 %v31_v11, %v30_v10  ;;  %v32_v13 = vld [vmem:[%s308_s1 + $0x40] sm:$0xff]  ;;  %v33_v14 = vld [vmem:[%s308_s1 + $0x48] sm:$0xff]  ;;  %v34_v16 = vld [vmem:[%s308_s1 + $0x50] sm:$0xff] }
   0x5   :  { %196 = vmatpush3.bf16.msra.mxu0 %v193_v3  ;;  %v209_v15 = vpack.c.bf16 %v33_v14, %v32_v13  ;;  %v35_v17 = vld [vmem:[%s308_s1 + $0x58] sm:$0xff]  ;;  %v36_v19 = vld [vmem:[%s308_s1 + $0x60] sm:$0xff]  ;;  %v37_v20 = vld [vmem:[%s308_s1 + $0x68] sm:$0xff] }
   0x6   :  { %198 = vmatprep.subr.bf16.mxu0 %v197_v5  ;;  %v213_v18 = vpack.c.bf16 %v35_v17, %v34_v16  ;;  %v217_v21 = vpack.c.bf16 %v37_v20, %v36_v19  ;;  %v38_v22 = vld [vmem:[%s308_s1 + $0x70] sm:$0xff]  ;;  %v39_v23 = vld [vmem:[%s308_s1 + $0x78] sm:$0xff]  ;;  %v23_v25 = vld [vmem:[%s309_s0 + $0x8] sm:$0xff] }
   0x7   :  { %v221_v24 = vpack.c.bf16 %v39_v23, %v38_v22  ;;  %v139_v26 = vld [vmem:[%s310_s2] ss:$0 sm:$0xff] }
   0x9   :  { %200 = vmatpush3.bf16.msra.mxu0 %v197_v5 }
   0xa   :  { %202 = vmatprep.subr.bf16.mxu0 %v201_v8 }
   0xd   :  { %204 = vmatpush3.bf16.msra.mxu0 %v201_v8 }
   0xe   :  { %206 = vmatprep.subr.bf16.mxu0 %v205_v12 }
  0x11   :  { %208 = vmatpush3.bf16.msra.mxu0 %v205_v12 }
  0x12   :  { %210 = vmatprep.subr.bf16.mxu0 %v209_v15 }
  0x15   :  { %212 = vmatpush3.bf16.msra.mxu0 %v209_v15 }
  0x16   :  { %214 = vmatprep.subr.bf16.mxu0 %v213_v18 }
  0x19   :  { %216 = vmatpush3.bf16.msra.mxu0 %v213_v18 }
  0x1a   :  { %218 = vmatprep.subr.bf16.mxu0 %v217_v21 }
  0x1d   :  { %220 = vmatpush3.bf16.msra.mxu0 %v217_v21 }
  0x1e   :  { %222 = vmatprep.subr.bf16.mxu0 %v221_v24 }
  0x21   :  { %224 = vmatpush3.bf16.msra.mxu0 %v221_v24 }
  0x24   :  { %191 = vmatmul.mubr.f32.vlgmr.msra.gmra.mrb[0].mxu0 %v23_v25 }
  0xf7   :  { %v192_v27 = vpop.f32.mrb[0].mxu0 }
  0xf8   :  { %v132_v28 = vadd.f32 %v192_v27, %v139_v26  ;;  %v106_v29 = vpop.f32.mrb[1].mxu0 }
  0xf9   :  { %v131_v30 = vadd.f32 %v139_v26, %v106_v29 }
  0xfa   :  { %134 = vst [vmem:[%s311_s3 + $0x8] sm:$0xff] %v132_v28 }
  0xfb   :  { %133 = vst [vmem:[%s311_s3] sm:$0xff] %v131_v30 }

// kernel: _mha_forward.4
= control target key start
LH: loop header
LB: loop body
LE: loop exit
PB: predicated region body
PF: predicated region fallthrough
CT: control target
= control target key end

     0   :  { %s1393_s12 = smov 0   ;;  %s1395_s13 = smov 0   ;;  %s1533_s0 = inlined_call_operand.vmem [shape: f32[2,8,32], index: 0, kind: input, shape index: {}]   ;;  %s1534_s1 = inlined_call_operand.vmem [shape: f32[2,8,16], index: 1, kind: input, shape index: {}]   ;;  %s1535_s2 = inlined_call_operand.vmem [shape: f32[2,8,16], index: 2, kind: input, shape index: {}]   ;;  %s1536_s3 = inlined_call_operand.vmem [shape: f32[2,8,32], index: 3, kind: output, shape index: {}]  }
   0x1   :  { %s1397_s14 = smov 0  }
   0x2 LB: > { %s32_s15 = sadd.s32 1, %s1357_s13  ;;  %p1204_p0 = scmp.ge.s32.totalorder %s1361_s14, 1  ;;  %s1361_s14 = sphi %s1397_s14, %s13_s14   ;;  %s1357_s13 = sphi %s1395_s13, %s1538_s13   ;;  %s1353_s12 = sphi %s1393_s12, %s1537_s12  }
   0x3   : > { %p34_p1 = scmp.ge.s32.totalorder %s32_s15, 2  ;;  %p190_p2 = scmp.lt.s32.totalorder %s1361_s14, 3 }
   0x5   : > { %s1540_s15 = smov (%p34_p1, %s32_s15), 0  ;;  %p191_p3 = pnand %p1204_p0, %p190_p2 }
   0x6   : > { %p232_p4 = scmp.lt.s32.totalorder (!%p191_p3), %s1353_s12, 1  ;;  %vm273_vm0 = vcmask (!%p191_p3), 64512   ;;  %v1363_v0 = vmov (!%p191_p3), 0.0   ;;  %vm1364_vm1 = vmmov (!%p191_p3), 0   ;;  %vm264_vm2 = vcmask (!%p191_p3), 7168   ;;  %s1367_s23 = smov (!%p191_p3), 120  }
   0x7   : > { %194 = sbr.rel (%p191_p3) target bundleno = 1444 (0x5a4), region = 32  ;;  %1239 = vmatprep.subr.mxu0 (!%p191_p3), %v1363_v0  ;;  %274 = vst.msk [vmem:[#allocation4] sm:$0xff] (!%p191_p3), %vm273_vm0, %v1363_v0  ;;  %275 = vst.msk [vmem:[#allocation4 + $0x8] sm:$0xff] (!%p191_p3), %vm273_vm0, %v1363_v0  ;;  %1241 = vmatprep.mubr.msk.f32.mxu0 (!%p191_p3), %vm1364_vm1, %v1363_v0  ;;  %v1365_v4 = vmov (!%p191_p3), -inf   ;;  %v1366_v8 = vmov (!%p191_p3), 0   ;;  %s1368_s24 = smov (!%p191_p3), 112  }
   0x8   : > { %276 = vst.msk [vmem:[#allocation4 + $0x10] sm:$0xff] (!%p191_p3), %vm273_vm0, %v1363_v0  ;;  %277 = vst.msk [vmem:[#allocation4 + $0x18] sm:$0xff] (!%p191_p3), %vm273_vm0, %v1363_v0  ;;  %1244 = vmatprep.subr.mxu1 (!%p191_p3), %v1363_v0  ;;  %1246 = vmatprep.mubr.msk.f32.mxu1 (!%p191_p3), %vm1364_vm1, %v1363_v0  ;;  %s1369_s25 = smov (!%p191_p3), 104   ;;  %s1370_s29 = smov (!%p191_p3), 8   ;;  %vm1087_vm3 = vcmask (!%p191_p3), 130048   ;;  %vm1089_vm4 = vcmask (!%p191_p3), 195584  }
   0x9   : > { %265 = vst.msk [vmem:[#allocation2] sm:$0xff] (!%p191_p3), %vm264_vm2, %v1365_v4  ;;  %266 = vst.msk [vmem:[#allocation2 + $0x8] sm:$0xff] (!%p191_p3), %vm264_vm2, %v1365_v4  ;;  %1313 = vset.pattern.permute.xlu0 (!%p191_p3), %v1366_v8  ;;  %1314 = vset.pattern.permute.xlu1 (!%p191_p3), %v1366_v8  ;;  %s1371_s30 = smov (!%p191_p3), 16   ;;  %s1372_s4 = smov (!%p191_p3), 24   ;;  %vm1091_vm5 = vcmask (!%p191_p3), 261120  }
   0xa   : > { %267 = vst.msk [vmem:[#allocation2 + $0x10] sm:$0xff] (!%p191_p3), %vm264_vm2, %v1365_v4  ;;  %268 = vst.msk [vmem:[#allocation2 + $0x18] sm:$0xff] (!%p191_p3), %vm264_vm2, %v1365_v4 }
   0xb   : > { %269 = vst.msk [vmem:[#allocation3] sm:$0xff] (!%p191_p3), %vm264_vm2, %v1363_v0  ;;  %270 = vst.msk [vmem:[#allocation3 + $0x8] sm:$0xff] (!%p191_p3), %vm264_vm2, %v1363_v0 }
   0xc   : > { %271 = vst.msk [vmem:[#allocation3 + $0x10] sm:$0xff] (!%p191_p3), %vm264_vm2, %v1363_v0  ;;  %272 = vst.msk [vmem:[#allocation3 + $0x18] sm:$0xff] (!%p191_p3), %vm264_vm2, %v1363_v0 }
   0xe   : > { %s1542_s12 = smov (!%p232_p4, %s1353_s12), 1 }
   0xf   : > { %s1425_s16 = sshll.u32 %s1542_s12, 3 }
  0x10   : > { %s238_s19 = scalar_lea.vmem %s1533_s0, %s1425_s16  ;;  %s245_s22 = scalar_lea.vmem %s1534_s1, %s1425_s16  ;;  %v1455_v9 = vld [vmem:[#allocation2] sm:$0xff]  ;;  %v544_v33 = vld [vmem:[#allocation2 + $0x8] sm:$0xff] }
  0x11   : > { %v278_v1 = vld [vmem:[%s245_s22] sm:$0xff]  ;;  %s252_s28 = scalar_lea.vmem %s1535_s2, %s1425_s16  ;;  %v737_v36 = vld [vmem:[#allocation2 + $0x10] sm:$0xff]  ;;  %v927_v40 = vld [vmem:[#allocation2 + $0x18] sm:$0xff]  ;;  %s259_s7 = scalar_lea.vmem %s1536_s3, %s1425_s16 }
  0x12   : > { %v280_v2 = vld [vmem:[%s238_s19] sm:$0xff]  ;;  %1240 = vmatpush3.xpose.msk.msra.mxu0 %vm273_vm0, %v278_v1 }
  0x13   : > { %v281_v3 = vmul.f32 0.35355338, %v280_v2  ;;  %1254 = vmatprep.subr.mxu0 %v1363_v0  ;;  %v279_v13 = vld [vmem:[%s252_s28] sm:$0xff] }
  0x14   : > { %1245 = vmatpush3.msra.mxu1 %v279_v13 }
  0x15   : > { %1242 = vmatmul.mubr.msk.f32.vlgmr.msra.gmra.mrb[0].mxu0 %vm273_vm0, %v281_v3  ;;  %469 = vrot.lane.b32.xlu1 %v281_v3, %s1367_s23 }
  0x16   : > { %1256 = vmatprep.mubr.msk.f32.mxu0 %vm1364_vm1, %v1363_v0  ;;  %1255 = vmatpush3.msra.mxu0 %v279_v13 }
  0x17   : > { %1249 = vmatprep.subr.mxu1 %v1363_v0  ;;  %1264 = vmatprep.subr.mxu0 %v1363_v0 }
  0x19   : > { %660 = vrot.lane.b32.xlu1 %v278_v1, %s1367_s23 }
  0x1d   : > { %657 = vrot.lane.b32.xlu1 %v281_v3, %s1368_s24 }
  0x21   : > { %852 = vrot.lane.b32.xlu1 %v281_v3, %s1369_s25 }
  0x87   : > { %v470_v17 = vpop.permute.xlu1 %469 }
  0x8b   : > { %v661_v18 = vpop.permute.xlu1 %660 }
  0x8f   : > { %v658_v20 = vpop.permute.xlu1 %657 }
  0x93   : > { %v853_v21 = vpop.permute.xlu1 %852 }
  0xe8   : > { %v355_v5 = vpop.f32.mrb[0].mxu0 }
  0xe9   : > { %v1243_v6 = vpop.f32.mrb[1].mxu0  ;;  %v360_v7 = vsel %vm273_vm0, %v355_v5, -inf }
  0xea   : > { %361 = vmax.xlane.f32.xlu0 %v360_v7  ;;  %v375_v6 = vld [vmem:[#allocation3] sm:$0xff] }
 0x177   : > { %v362_v10 = vpop.xlane.xlu0 %361 }
 0x178   : > { %v1458_v11 = vmax.f32 %v1455_v9, %v362_v10 }
 0x17a   : > { %v364_v12 = vsub.f32 %v1455_v9, %v1458_v11  ;;  %465 = vst.msk [vmem:[#allocation2] sm:$0xff] %vm264_vm2, %v1458_v11  ;;  %369 = vperm.xlu0 %1313, %v1458_v11  }
 0x17c   : > { %v365_v61 = vmul.f32 1.442695, %v364_v12  ;;  %v561_v12 = vld [vmem:[#allocation3 + $0x8] sm:$0xff] }
 0x1f9   : > { %v370_v14 = vpop.permute.xlu0 %369 }
 0x1fa   : > { %v372_v15 = vsub.f32 %v355_v5, %v370_v14 }
 0x1fc   : > { %v373_v16 = vmul.f32 1.442695, %v372_v15  ;;  %v754_v15 = vld [vmem:[#allocation3 + $0x10] sm:$0xff] }
 0x1fe   : > { %1315 = vpow2.f32 %v373_v16 }
 0x208   : > { %v1316_v19 = vpop.eup %1315 }
 0x209   : > { %1247 = vmatmul.mubr.msk.f32.vlgmr.msra.gmra.mrb[0].mxu1 %vm273_vm0, %v1316_v19  ;;  %v377_v45 = vsel %vm273_vm0, %v1316_v19, 0.0  ;;  %v944_v19 = vld [vmem:[#allocation3 + $0x18] sm:$0xff] }
 0x20a   : > { %1250 = vmatpush3.xpose.msk.msra.mxu1 %vm273_vm0, %v278_v1  ;;  %1251 = vmatprep.mubr.msk.f32.mxu1 %vm1364_vm1, %v1363_v0 }
 0x20b   : > { %1259 = vmatprep.subr.mxu1 %v1363_v0 }
 0x20d   : > { %1252 = vmatmul.mubr.msk.f32.vlgmr.msra.gmra.mrb[2].mxu1 %vm273_vm0, %v470_v17 }
 0x20e   : > { %1260 = vmatpush3.xpose.msk.msra.mxu1 %vm273_vm0, %v661_v18  ;;  %1261 = vmatprep.mubr.msk.f32.mxu1 %vm1364_vm1, %v1363_v0 }
 0x20f   : > { %1269 = vmatprep.subr.mxu1 %v1363_v0 }
 0x211   : > { %1262 = vmatmul.mubr.msk.f32.vlgmr.msra.gmra.mrb[4].mxu1 %vm273_vm0, %v658_v20 }
 0x212   : > { %1270 = vmatpush3.xpose.msk.msra.mxu1 %vm273_vm0, %v661_v18  ;;  %1271 = vmatprep.mubr.msk.f32.mxu1 %vm1364_vm1, %v1363_v0 }
 0x215   : > { %1272 = vmatmul.mubr.msk.f32.vlgmr.msra.gmra.mrb[6].mxu1 %vm273_vm0, %v853_v21  ;;  %v383_v21 = vld [vmem:[#allocation4] sm:$0xff] }
 0x2dc   : > { %v1486_v22 = vpop.f32.mrb[0].mxu1 }
 0x2dd   : > { %v1248_v23 = vpop.f32.mrb[1].mxu1 }
 0x2e0   : > { %v539_v24 = vpop.f32.mrb[2].mxu1 }
 0x2e1   : > { %v1253_v25 = vpop.f32.mrb[3].mxu1  ;;  %v545_v26 = vsel %vm273_vm0, %v539_v24, -inf }
 0x2e2   : > { %546 = vmax.xlane.f32.xlu1 %v545_v26 }
 0x2e4   : > { %v732_v27 = vpop.f32.mrb[4].mxu1 }
 0x2e5   : > { %v1263_v28 = vpop.f32.mrb[5].mxu1  ;;  %v738_v29 = vsel %vm273_vm0, %v732_v27, -inf }
 0x2e6   : > { %739 = vmax.xlane.f32.xlu0 %v738_v29 }
 0x2e8   : > { %v922_v30 = vpop.f32.mrb[6].mxu1 }
 0x2e9   : > { %v1273_v31 = vpop.f32.mrb[7].mxu1  ;;  %v928_v32 = vsel %vm273_vm0, %v922_v30, -inf }
 0x2ea   : > { %929 = vmax.xlane.f32.xlu1 %v928_v32 }
 0x2fc   : > { %770 = vrot.lane.b32.xlu0 %v279_v13, %s1367_s23 }
 0x36f   : > { %v547_v34 = vpop.xlane.xlu1 %546 }
 0x370   : > { %v548_v35 = vmax.f32 %v544_v33, %v547_v34 }
 0x372   : > { %v549_v37 = vsub.f32 %v544_v33, %v548_v35  ;;  %651 = vst.msk [vmem:[#allocation2 + $0x8] sm:$0xff] %vm264_vm2, %v548_v35  ;;  %554 = vperm.xlu1 %1314, %v548_v35   ;;  %v569_v35 = vld [vmem:[#allocation4 + $0x8] sm:$0xff] }
 0x373   : > { %v740_v38 = vpop.xlane.xlu0 %739 }
 0x374   : > { %v741_v39 = vmax.f32 %v737_v36, %v740_v38  ;;  %v550_v63 = vmul.f32 1.442695, %v549_v37  ;;  %v762_v38 = vld [vmem:[#allocation4 + $0x10] sm:$0xff] }
 0x376   : > { %v742_v41 = vsub.f32 %v737_v36, %v741_v39  ;;  %848 = vst.msk [vmem:[#allocation2 + $0x10] sm:$0xff] %vm264_vm2, %v741_v39  ;;  %747 = vperm.xlu1 %1314, %v741_v39  }
 0x377   : > { %v930_v42 = vpop.xlane.xlu1 %929  ;;  %v771_v55 = vpop.permute.xlu0 %770 }
 0x378   : > { %v931_v43 = vmax.f32 %v927_v40, %v930_v42  ;;  %v743_v1 = vmul.f32 1.442695, %v742_v41 }
 0x37a   : > { %v932_v44 = vsub.f32 %v927_v40, %v931_v43  ;;  %1034 = vst.msk [vmem:[#allocation2 + $0x18] sm:$0xff] %vm264_vm2, %v931_v43  ;;  %937 = vperm.xlu1 %1314, %v931_v43   ;;  %v952_v43 = vld [vmem:[#allocation4 + $0x18] sm:$0xff] }
 0x37c   : > { %v933_v2 = vmul.f32 1.442695, %v932_v44 }
 0x39e   : > { %378 = vadd.xlane.f32.xlu1 %v377_v45 }
 0x3f1   : > { %v555_v46 = vpop.permute.xlu1 %554 }
 0x3f2   : > { %v557_v47 = vsub.f32 %v539_v24, %v555_v46 }
 0x3f4   : > { %v558_v48 = vmul.f32 1.442695, %v557_v47 }
 0x3f5   : > { %v748_v49 = vpop.permute.xlu1 %747 }
 0x3f6   : > { %1317 = vpow2.f32 %v558_v48  ;;  %v750_v50 = vsub.f32 %v732_v27, %v748_v49 }
 0x3f8   : > { %v751_v51 = vmul.f32 1.442695, %v750_v50 }
 0x3f9   : > { %v938_v52 = vpop.permute.xlu1 %937 }
 0x3fa   : > { %1319 = vpow2.f32 %v751_v51  ;;  %v940_v53 = vsub.f32 %v922_v30, %v938_v52 }
 0x3fc   : > { %v941_v54 = vmul.f32 1.442695, %v940_v53 }
 0x3fe   : > { %1321 = vpow2.f32 %v941_v54 }
 0x3ff   : > { %1323 = vpow2.f32 %v365_v61 }
 0x400   : > { %v1318_v56 = vpop.eup %1317  ;;  %1325 = vpow2.f32 %v550_v63 }
 0x401   : > { %1257 = vmatmul.mubr.msk.f32.vlgmr.msra.gmra.mrb[2].mxu0 %vm273_vm0, %v1318_v56  ;;  %v563_v57 = vsel %vm273_vm0, %v1318_v56, 0.0  ;;  %1327 = vpow2.f32 %v743_v1 }
 0x402   : > { %564 = vadd.xlane.f32.xlu0 %v563_v57  ;;  %1265 = vmatpush3.msra.mxu0 %v771_v55  ;;  %1329 = vpow2.f32 %v933_v2 }
 0x403   : > { %1266 = vmatprep.mubr.msk.f32.mxu0 %vm1364_vm1, %v1363_v0  ;;  %1274 = vmatprep.subr.mxu0 %v1363_v0 }
 0x404   : > { %v1320_v58 = vpop.eup %1319 }
 0x405   : > { %1267 = vmatmul.mubr.msk.f32.vlgmr.msra.gmra.mrb[4].mxu0 %vm273_vm0, %v1320_v58  ;;  %v756_v59 = vsel %vm273_vm0, %v1320_v58, 0.0 }
 0x406   : > { %757 = vadd.xlane.f32.xlu1 %v756_v59  ;;  %1275 = vmatpush3.msra.mxu0 %v771_v55 }
 0x407   : > { %1276 = vmatprep.mubr.msk.f32.mxu0 %vm1364_vm1, %v1363_v0 }
 0x408   : > { %v1322_v60 = vpop.eup %1321 }
 0x409   : > { %1277 = vmatmul.mubr.msk.f32.vlgmr.msra.gmra.mrb[6].mxu0 %vm273_vm0, %v1322_v60  ;;  %v946_v62 = vsel %vm273_vm0, %v1322_v60, 0.0  ;;  %v1324_v3 = vpop.eup %1323 }
 0x40a   : > { %947 = vadd.xlane.f32.xlu1 %v946_v62  ;;  %v1326_v0 = vpop.eup %1325  ;;  %v376_v7 = vmul.f32 %v1324_v3, %v375_v6 }
 0x40b   : > { %v1328_v4 = vpop.eup %1327  ;;  %v562_v13 = vmul.f32 %v1326_v0, %v561_v12 }
 0x40c   : > { %v1330_v5 = vpop.eup %1329  ;;  %v755_v17 = vmul.f32 %v1328_v4, %v754_v15 }
 0x40d   : > { %v945_v23 = vmul.f32 %v1330_v5, %v944_v19 }
 0x418   : > { %386 = vperm.xlu0 %1313, %v1324_v3  }
 0x41b   : > { %572 = vperm.xlu1 %1314, %v1326_v0  }
 0x41c   : > { %765 = vperm.xlu0 %1313, %v1328_v4  }
 0x41f   : > { %955 = vperm.xlu1 %1314, %v1330_v5  }
 0x42b   : > { %v379_v8 = vpop.xlane.xlu1 %378 }
 0x42c   : > { %v380_v9 = vadd.f32 %v379_v8, %v376_v7 }
 0x42e   : > { %382 = vst.msk [vmem:[#allocation3] sm:$0xff] %vm264_vm2, %v380_v9 }
 0x435   : > { %v1038_v10 = vld [vmem:[#allocation3] sm:$0xff] }
 0x436   : > { %1331 = vrcp.f32 %v1038_v10 }
 0x440   : > { %v1332_v11 = vpop.eup %1331 }
 0x441   : > { %1043 = vperm.xlu1 %1314, %v1332_v11  }
 0x48f   : > { %v565_v14 = vpop.xlane.xlu0 %564 }
 0x490   : > { %v566_v16 = vadd.f32 %v565_v14, %v562_v13 }
 0x492   : > { %567 = vst.msk [vmem:[#allocation3 + $0x8] sm:$0xff] %vm264_vm2, %v566_v16 }
 0x493   : > { %v758_v18 = vpop.xlane.xlu1 %757 }
 0x494   : > { %v759_v20 = vadd.f32 %v758_v18, %v755_v17 }
 0x496   : > { %760 = vst.msk [vmem:[#allocation3 + $0x10] sm:$0xff] %vm264_vm2, %v759_v20 }
 0x497   : > { %v948_v24 = vpop.xlane.xlu1 %947  ;;  %v387_v25 = vpop.permute.xlu0 %386 }
 0x498   : > { %v949_v26 = vadd.f32 %v948_v24, %v945_v23  ;;  %v389_v27 = vmul.f32 %v387_v25, %v383_v21 }
 0x499   : > { %v1047_v28 = vld [vmem:[#allocation3 + $0x8] sm:$0xff] }
 0x49a   : > { %950 = vst.msk [vmem:[#allocation3 + $0x18] sm:$0xff] %vm264_vm2, %v949_v26  ;;  %v463_v29 = vadd.f32 %v1486_v22, %v389_v27  ;;  %1333 = vrcp.f32 %v1047_v28 }
 0x49b   : > { %v573_v36 = vpop.permute.xlu1 %572  ;;  %v766_v39 = vpop.permute.xlu0 %765 }
 0x49c   : > { %464 = vst.msk [vmem:[#allocation4] sm:$0xff] %vm273_vm0, %v463_v29  ;;  %v575_v37 = vmul.f32 %v573_v36, %v569_v35  ;;  %v768_v42 = vmul.f32 %v766_v39, %v762_v38 }
 0x49d   : > { %v1056_v30 = vld [vmem:[#allocation3 + $0x10] sm:$0xff] }
 0x49e   : > { %1335 = vrcp.f32 %v1056_v30 }
 0x49f   : > { %v956_v44 = vpop.permute.xlu1 %955 }
 0x4a0   : > { %v958_v48 = vmul.f32 %v956_v44, %v952_v43 }
 0x4a1   : > { %v1065_v31 = vld [vmem:[#allocation3 + $0x18] sm:$0xff] }
 0x4a2   : > { %1337 = vrcp.f32 %v1065_v31 }
 0x4a3   : > { %v1040_v62 = vld [vmem:[#allocation4] sm:$0xff] }
 0x4a4   : > { %v1334_v32 = vpop.eup %1333 }
 0x4a5   : > { %1052 = vperm.xlu1 %1314, %v1334_v32  }
 0x4a8   : > { %v1336_v33 = vpop.eup %1335 }
 0x4a9   : > { %1061 = vperm.xlu1 %1314, %v1336_v33  }
 0x4ac   : > { %v1338_v34 = vpop.eup %1337 }
 0x4ad   : > { %1070 = vperm.xlu0 %1313, %v1338_v34  }
 0x4c0   : > { %v1044_v52 = vpop.permute.xlu1 %1043 }
 0x4c1   : > { %v1046_v1 = vmul.f32 %v1044_v52, %v1040_v62 }
 0x4d4   : > { %v645_v40 = vpop.f32.mrb[2].mxu0 }
 0x4d5   : > { %v649_v22 = vadd.f32 %v645_v40, %v575_v37  ;;  %v1258_v41 = vpop.f32.mrb[3].mxu0 }
 0x4d7   : > { %650 = vst.msk [vmem:[#allocation4 + $0x8] sm:$0xff] %vm273_vm0, %v649_v22 }
 0x4d8   : > { %v842_v45 = vpop.f32.mrb[4].mxu0 }
 0x4d9   : > { %v846_v46 = vadd.f32 %v842_v45, %v768_v42  ;;  %v1268_v47 = vpop.f32.mrb[5].mxu0 }
 0x4db   : > { %847 = vst.msk [vmem:[#allocation4 + $0x10] sm:$0xff] %vm273_vm0, %v846_v46 }
 0x4dc   : > { %v1028_v49 = vpop.f32.mrb[6].mxu0 }
 0x4dd   : > { %v1032_v50 = vadd.f32 %v1028_v49, %v958_v48  ;;  %v1278_v51 = vpop.f32.mrb[7].mxu0 }
 0x4de   : > { %v1049_v54 = vld [vmem:[#allocation4 + $0x8] sm:$0xff] }
 0x4df   : > { %1033 = vst.msk [vmem:[#allocation4 + $0x18] sm:$0xff] %vm273_vm0, %v1032_v50 }
 0x4e2   : > { %v1058_v57 = vld [vmem:[#allocation4 + $0x10] sm:$0xff] }
 0x4e6   : > { %v1067_v60 = vld [vmem:[#allocation4 + $0x18] sm:$0xff] }
 0x524   : > { %v1053_v53 = vpop.permute.xlu1 %1052 }
 0x525   : > { %v1055_v55 = vmul.f32 %v1053_v53, %v1049_v54 }
 0x527   : > { %1075 = vrot.lane.b32.xlu1 %v1055_v55, %s1370_s29 }
 0x528   : > { %v1062_v56 = vpop.permute.xlu1 %1061 }
 0x529   : > { %v1064_v58 = vmul.f32 %v1062_v56, %v1058_v57 }
 0x52b   : > { %1079 = vrot.lane.b32.xlu0 %v1064_v58, %s1371_s30 }
 0x52c   : > { %v1071_v59 = vpop.permute.xlu0 %1070 }
 0x52d   : > { %v1073_v61 = vmul.f32 %v1071_v59, %v1067_v60 }
 0x52f   : > { %1083 = vrot.lane.b32.xlu1 %v1073_v61, %s1372_s4 }
 0x599   : > { %v1076_v63 = vpop.permute.xlu1 %1075 }
 0x59a   : > { %v1086_v3 = vsel %vm273_vm0, %v1046_v1, %v1076_v63 }
 0x59d   : > { %v1080_v2 = vpop.permute.xlu0 %1079 }
 0x59e   : > { %v1088_v0 = vsel %vm1087_vm3, %v1086_v3, %v1080_v2 }
 0x5a1   : > { %v1084_v4 = vpop.permute.xlu1 %1083 }
 0x5a2   : > { %v1090_v5 = vsel %vm1089_vm4, %v1088_v0, %v1084_v4 }
 0x5a3   : > { %1092 = vst.msk [vmem:[%s259_s7] sm:$0xff] %vm1091_vm5, %v1090_v5 }
 0x5a4 PF: > { %s13_s14 = sadd.s32 1, %s1361_s14   ;;  %s1537_s12 = smov %s1357_s13 }
 0x5a5   : > { %p10_p5 = scmp.ge.s32.totalorder %s13_s14, 4   ;;  %s1538_s13 = smov %s1540_s15 }
 0x5a7   :  { %12 = sbr.rel (!%p10_p5) target bundleno = 2 (0x2), region = 85 }

</bundles_post_ra>
